<compile_context>
chip_gen: v7x
topology: tpu7x:2x2x1
jax: 0.10.0
libtpu: 0.0.40
codegen_flags: <defaults>
</compile_context>

<pallas_src>
import functools

import jax
import jax.numpy as jnp
from jax.experimental import pallas as pl
from jax.experimental.pallas import tpu as pltpu

MARGIN = 1.0
EPS = 1e-6  # PyTorch pairwise_distance default eps (added to the difference)

# Target per-step VMEM working set (inputs x 2 buffers + f32 temps).  Safe on
# every generation: well under v7x's 64 MiB/TC, and we raise vmem_limit_bytes
# explicitly above the v5e 16 MiB scoped default when needed.
_TARGET_WORKING_SET = 20 * 1024 * 1024
_VMEM_LIMIT_CAP = 48 * 1024 * 1024


def _sublane_align(dtype) -> int:
    """Rows per packed sublane group: 8 for f32, 16 for bf16/f16, 32 for 1B."""
    itemsize = jnp.dtype(dtype).itemsize
    return max(8, 8 * (4 // max(1, itemsize)))


def _triplet_loss_kernel(a_ref, p_ref, n_ref, out_ref, *,
                         margin, total_rows, tile_rows):
    i = pl.program_id(0)

    # d(x, y) = ||x - y + eps||_2 along the feature (lane) axis.
    # Fold the f32 upcast into each difference so only one full-tile f32
    # temporary is live at a time (matters for bf16/fp8 inputs).
    dp = a_ref[...].astype(jnp.float32) - p_ref[...].astype(jnp.float32) + EPS
    d_ap = jnp.sqrt(jnp.sum(dp * dp, axis=-1, keepdims=True))    # (tb, 1)
    dn = a_ref[...].astype(jnp.float32) - n_ref[...].astype(jnp.float32) + EPS
    d_an = jnp.sqrt(jnp.sum(dn * dn, axis=-1, keepdims=True))    # (tb, 1)

    loss = jnp.maximum(d_ap - d_an + margin, 0.0)                # (tb, 1)

    # Ragged last tile: padded input rows hold stale VMEM garbage; select them
    # away before the partial sum (load-bearing now that we reduce in-kernel).
    # Trace-time check: no masking code at all when the tiling is exact.
    if total_rows % tile_rows != 0:
        row = jax.lax.broadcasted_iota(jnp.int32, loss.shape, 0) + i * tile_rows
        loss = jnp.where(row < total_rows, loss, 0.0)

    s = jnp.sum(loss)  # per-tile partial sum (scalar)

    # Lane/sublane-compliant (1, 8, 128) output block: the partial sum sits at
    # [0, 0, 0], zeros elsewhere -> exactly one vreg, one unmasked store/step.
    r = jax.lax.broadcasted_iota(jnp.int32, (1, 8, 128), 1)
    c = jax.lax.broadcasted_iota(jnp.int32, (1, 8, 128), 2)
    out_ref[...] = jnp.where((r == 0) & (c == 0), s, 0.0)


def triplet_margin_loss(anchor, positive, negative, margin=MARGIN,
                        target_working_set_bytes=_TARGET_WORKING_SET):
    """anchor/positive/negative: (batch, features), any float dtype.
    Returns the scalar mean triplet margin loss in float32."""
    B, D = anchor.shape
    itemsize = jnp.dtype(anchor.dtype).itemsize
    align = _sublane_align(anchor.dtype)

    # Per-row VMEM footprint of one grid step:
    #   3 inputs x 2 pipeline buffers x D x itemsize   (auto double-buffering)
    # + ~2 full-tile f32 temporaries (dp/dn differences and squares).
    per_row = 3 * 2 * D * itemsize + 2 * D * 4
    tb = max(align, min(B, target_working_set_bytes // per_row))
    if tb < B:
        tb = max(align, (tb // align) * align)  # dtype-aware sublane alignment
    # Guarantee >= 2 grid steps whenever the batch allows it so v7x's second
    # TensorCore gets work under "parallel"; harmless on single-TC v5e/v6e.
    if tb >= B and B >= 2 * align:
        tb = align * pl.cdiv(B, 2 * align)
    num_tiles = pl.cdiv(B, tb)

    working_set = tb * per_row + 2 * 8 * 128 * 4  # + double-buffered output
    vmem_limit = int(min(max(working_set * 5 // 4 + (1 << 20), 16 << 20),
                         _VMEM_LIMIT_CAP))

    kernel = functools.partial(
        _triplet_loss_kernel,
        margin=float(margin), total_rows=B, tile_rows=tb)

    in_spec = pl.BlockSpec((tb, D), lambda i: (i, 0))
    partial_sums = pl.pallas_call(
        kernel,
        out_shape=jax.ShapeDtypeStruct((num_tiles, 8, 128), jnp.float32),
        grid=(num_tiles,),
        in_specs=[in_spec, in_spec, in_spec],
        out_specs=pl.BlockSpec((1, 8, 128), lambda i: (i, 0, 0)),
        compiler_params=pltpu.CompilerParams(
            dimension_semantics=("parallel",),
            vmem_limit_bytes=vmem_limit),
    )(anchor, positive, negative)

    # All entries except [i, 0, 0] are zero, so a plain sum is exact.
    return jnp.sum(partial_sums) / B


def _reference(anchor, positive, negative, margin=MARGIN):
    a = anchor.astype(jnp.float32)
    p = positive.astype(jnp.float32)
    n = negative.astype(jnp.float32)
    d_ap = jnp.linalg.norm(a - p + EPS, axis=-1)
    d_an = jnp.linalg.norm(a - n + EPS, axis=-1)
    return jnp.mean(jnp.maximum(d_ap - d_an + margin, 0.0))


if __name__ == "__main__":
    key = jax.random.PRNGKey(0)
    k1, k2, k3 = jax.random.split(key, 3)
    B, D = 200, 128  # small; lane-aligned features
    anchor = jax.random.normal(k1, (B, D), dtype=jnp.float32)
    positive = jax.random.normal(k2, (B, D), dtype=jnp.float32)
    negative = jax.random.normal(k3, (B, D), dtype=jnp.float32)

    ref = _reference(anchor, positive, negative)

    # 1) default tiling: bytes-based budget, forced >=2 tiles (104 + ragged 96).
    out = jax.block_until_ready(triplet_margin_loss(anchor, positive, negative))
    assert jnp.allclose(out, ref, rtol=1e-5, atol=1e-5), (out, ref)

    # 2) force a many-tile grid with a ragged last tile (48-row tiles -> 5
    #    tiles, 8 valid rows in the last) to exercise pipelining + masking.
    out_tiled = jax.block_until_ready(
        triplet_margin_loss(anchor, positive, negative,
                            target_working_set_bytes=200 * 1024))
    assert jnp.allclose(out_tiled, ref, rtol=1e-5, atol=1e-5), (out_tiled, ref)

    # 3) bf16 inputs stay bf16 in HBM (halves DMA traffic); kernel upcasts to
    #    f32 inside each difference. 16-row sublane alignment path.
    a16, p16, n16 = (x.astype(jnp.bfloat16) for x in (anchor, positive, negative))
    out_bf16 = jax.block_until_ready(
        triplet_margin_loss(a16, p16, n16,
                            target_working_set_bytes=200 * 1024))
    ref_bf16 = _reference(a16, p16, n16)
    assert jnp.allclose(out_bf16, ref_bf16, rtol=1e-4, atol=1e-4), (out_bf16, ref_bf16)

    print("KERNEL_OK")
</pallas_src>

<mosaic_0001>
module attributes {stable_mosaic.version = 11 : i64} {
  func.func @_triplet_loss_kernel(%arg0: i32, %arg1: memref<104x128xf32, #tpu.memory_space<vmem>>, %arg2: memref<104x128xf32, #tpu.memory_space<vmem>>, %arg3: memref<104x128xf32, #tpu.memory_space<vmem>>, %arg4: memref<1x8x128xf32, #tpu.memory_space<vmem>>) attributes {dimension_semantics = [#tpu.dimension_semantics<parallel>], iteration_bounds = array<i64: 2>, scalar_prefetch = 0 : i64, scratch_operands = 0 : i64, tpu.core_type = #tpu.core_type<tc>, window_params = [{transform_indices = @transform_0, window_bounds = array<i64: 104, 128>}, {transform_indices = @transform_1, window_bounds = array<i64: 104, 128>}, {transform_indices = @transform_2, window_bounds = array<i64: 104, 128>}, {transform_indices = @transform_3, window_bounds = array<i64: 1, 8, 128>}]} {
    %c0 = arith.constant 0 : index
    %c0_0 = arith.constant 0 : index
    %0 = vector.load %arg1[%c0, %c0_0] : memref<104x128xf32, #tpu.memory_space<vmem>>, vector<104x128xf32>
    %c0_1 = arith.constant 0 : index
    %c0_2 = arith.constant 0 : index
    %1 = vector.load %arg2[%c0_1, %c0_2] : memref<104x128xf32, #tpu.memory_space<vmem>>, vector<104x128xf32>
    %2 = arith.subf %0, %1 : vector<104x128xf32>
    %cst = arith.constant 9.99999997E-7 : f32
    %3 = vector.broadcast %cst : f32 to vector<104x128xf32>
    %4 = arith.addf %2, %3 : vector<104x128xf32>
    %5 = arith.mulf %4, %4 : vector<104x128xf32>
    %cst_3 = arith.constant dense<0.000000e+00> : vector<104xf32>
    %6 = vector.multi_reduction <add>, %5, %cst_3 [1] : vector<104x128xf32> to vector<104xf32>
    %7 = vector.shape_cast %6 : vector<104xf32> to vector<104x1xf32>
    %8 = math.sqrt %7 : vector<104x1xf32>
    %c0_4 = arith.constant 0 : index
    %c0_5 = arith.constant 0 : index
    %9 = vector.load %arg1[%c0_4, %c0_5] : memref<104x128xf32, #tpu.memory_space<vmem>>, vector<104x128xf32>
    %c0_6 = arith.constant 0 : index
    %c0_7 = arith.constant 0 : index
    %10 = vector.load %arg3[%c0_6, %c0_7] : memref<104x128xf32, #tpu.memory_space<vmem>>, vector<104x128xf32>
    %11 = arith.subf %9, %10 : vector<104x128xf32>
    %cst_8 = arith.constant 9.99999997E-7 : f32
    %12 = vector.broadcast %cst_8 : f32 to vector<104x128xf32>
    %13 = arith.addf %11, %12 : vector<104x128xf32>
    %14 = arith.mulf %13, %13 : vector<104x128xf32>
    %cst_9 = arith.constant dense<0.000000e+00> : vector<104xf32>
    %15 = vector.multi_reduction <add>, %14, %cst_9 [1] : vector<104x128xf32> to vector<104xf32>
    %16 = vector.shape_cast %15 : vector<104xf32> to vector<104x1xf32>
    %17 = math.sqrt %16 : vector<104x1xf32>
    %18 = arith.subf %8, %17 : vector<104x1xf32>
    %cst_10 = arith.constant 1.000000e+00 : f32
    %19 = vector.broadcast %cst_10 : f32 to vector<104x1xf32>
    %20 = arith.addf %18, %19 : vector<104x1xf32>
    %cst_11 = arith.constant 0.000000e+00 : f32
    %21 = vector.broadcast %cst_11 : f32 to vector<104x1xf32>
    %22 = arith.maximumf %20, %21 : vector<104x1xf32>
    %23 = tpu.iota {dimensions = array<i32: 0>} : vector<104x1xi32>
    %c104_i32 = arith.constant 104 : i32
    %24 = arith.muli %arg0, %c104_i32 : i32
    %25 = vector.broadcast %24 : i32 to vector<104x1xi32>
    %26 = arith.addi %23, %25 : vector<104x1xi32>
    %c200_i32 = arith.constant 200 : i32
    %27 = vector.broadcast %c200_i32 : i32 to vector<104x1xi32>
    %28 = arith.cmpi slt, %26, %27 : vector<104x1xi32>
    %cst_12 = arith.constant 0.000000e+00 : f32
    %29 = vector.broadcast %cst_12 : f32 to vector<104x1xf32>
    %30 = arith.select %28, %22, %29 : vector<104x1xi1>, vector<104x1xf32>
    %31 = vector.shape_cast %30 : vector<104x1xf32> to vector<1x104x1xf32>
    %cst_13 = arith.constant dense<0.000000e+00> : vector<1xf32>
    %32 = vector.multi_reduction <add>, %31, %cst_13 [1, 2] : vector<1x104x1xf32> to vector<1xf32>
    %33 = vector.shape_cast %32 : vector<1xf32> to vector<1x1x1xf32>
    %34 = vector.extract %33[0, 0, 0] : f32 from vector<1x1x1xf32>
    %35 = tpu.iota {dimensions = array<i32: 1>} : vector<1x8x128xi32>
    %36 = tpu.iota {dimensions = array<i32: 2>} : vector<1x8x128xi32>
    %c0_i32 = arith.constant 0 : i32
    %37 = vector.broadcast %c0_i32 : i32 to vector<1x8x128xi32>
    %38 = arith.cmpi eq, %35, %37 : vector<1x8x128xi32>
    %c0_i32_14 = arith.constant 0 : i32
    %39 = vector.broadcast %c0_i32_14 : i32 to vector<1x8x128xi32>
    %40 = arith.cmpi eq, %36, %39 : vector<1x8x128xi32>
    %41 = arith.andi %38, %40 : vector<1x8x128xi1>
    %cst_15 = arith.constant 0.000000e+00 : f32
    %42 = vector.broadcast %34 : f32 to vector<1x8x128xf32>
    %43 = vector.broadcast %cst_15 : f32 to vector<1x8x128xf32>
    %44 = arith.select %41, %42, %43 : vector<1x8x128xi1>, vector<1x8x128xf32>
    %c0_16 = arith.constant 0 : index
    %c0_17 = arith.constant 0 : index
    %c0_18 = arith.constant 0 : index
    %45 = vector.load %arg4[%c0_16, %c0_17, %c0_18] : memref<1x8x128xf32, #tpu.memory_space<vmem>>, vector<1x8x128xf32>
    tpu.vector_store %arg4[%c0_16, %c0_17, %c0_18], %44 {strides = array<i32>} : memref<1x8x128xf32, #tpu.memory_space<vmem>>, vector<1x8x128xf32>,
    return
  }
  func.func @transform_0(%arg0: i32) -> (i32, i32) {
    %c0_i32 = arith.constant 0 : i32
    %c0_i32_0 = arith.constant 0 : i32
    return %arg0, %c0_i32 : i32, i32
  }
  func.func @transform_1(%arg0: i32) -> (i32, i32) {
    %c0_i32 = arith.constant 0 : i32
    %c0_i32_0 = arith.constant 0 : i32
    return %arg0, %c0_i32 : i32, i32
  }
  func.func @transform_2(%arg0: i32) -> (i32, i32) {
    %c0_i32 = arith.constant 0 : i32
    %c0_i32_0 = arith.constant 0 : i32
    return %arg0, %c0_i32 : i32, i32
  }
  func.func @transform_3(%arg0: i32) -> (i32, i32, i32) {
    %c0_i32 = arith.constant 0 : i32
    %c0_i32_0 = arith.constant 0 : i32
    %c0_i32_1 = arith.constant 0 : i32
    return %arg0, %c0_i32, %c0_i32_0 : i32, i32, i32
  }
}

</mosaic_0001>

<bundles_post_ra>
// kernel: tpu_custom_call.1
= control target key start
LH: loop header
LB: loop body
LE: loop exit
PB: predicated region body
PF: predicated region fallthrough
CT: control target
= control target key end

     0   :  { %8 = vsyncpa [#allocation3], 0  ;;  %s1945_s0 = inlined_call_operand.hbm [shape: f32[200,128], index: 0, kind: input, shape index: {}]   ;;  %s1946_s1 = inlined_call_operand.hbm [shape: f32[200,128], index: 1, kind: input, shape index: {}]   ;;  %s1947_s2 = inlined_call_operand.hbm [shape: f32[200,128], index: 2, kind: input, shape index: {}]   ;;  %s1948_s3 = inlined_call_operand.hbm [shape: f32[2,8,128], index: 3, kind: output, shape index: {}]  }
   0x1   :  { %10 = vsyncpa [#allocation3 + $0x1], 0 }
   0x2   :  { %11 = vsyncpa [#allocation6], 0 }
   0x3   :  { %13 = vsyncpa [#allocation6 + $0x1], 0 }
   0x4   :  { %14 = vsyncpa [#allocation4], 0 }
   0x5   :  { %16 = vsyncpa [#allocation4 + $0x1], 0  ;;  %s1233_s12 = smov 0   ;;  %s1235_s13 = smov 0  }
   0x6   :  { %s1237_s14 = smov 0   ;;  %s1239_s15 = smov 0  }
   0x7 LB: > { %s1254_s16 = sadd.s32 4294967295, %s1201_s15   ;;  %s914_s17 = sadd.s32 4294967294, %s1201_s15   ;;  %s1201_s15 = sphi %s1239_s15, %s1974_s15   ;;  %s1197_s14 = sphi %s1237_s14, %s1973_s14   ;;  %s1193_s13 = sphi %s1235_s13, %s1972_s13   ;;  %s1189_s12 = sphi %s1233_s12, %s1971_s12  }
   0x8   : > { %s1258_s18 = sadd.s32 1, %s1201_s15   ;;  %s29_s19 = sadd.s32 1, %s1197_s14 }
   0x9   : > { %s26_s20 = ssub.s32 %s1201_s15, %s1258_s18  ;;  %p36_p0 = scmp.ne.s32.totalorder %s1197_s14, %s1193_s13 }
   0xa   : > { %p27_p1 = scmp.eq.s32.totalorder %s26_s20, 0  ;;  %p37_p2 = scmp.eq.s32.totalorder %s1201_s15, 0 }
   0xb   : > { %p42_p3 = scmp.ne.s32.totalorder %s1193_s13, %s1189_s12  ;;  %p43_p4 = scmp.eq.s32.totalorder %s1254_s16, 0 }
   0xc   : > { %s1270_s21 = scalar_select %p27_p1, %s1197_s14, %s29_s19  }
   0xd   : > { %p1272_p5 = por %p37_p2, %p36_p0  ;;  %p1276_p6 = por %p43_p4, %p42_p3 }
   0xe   : > { %p118_p7 = scmp.eq.s32.totalorder %s1254_s16, 1  ;;  %p124_p8 = scmp.eq.s32.totalorder %s914_s17, 1 }
   0xf   : > { %p1949_p11 = scmp.ge.s32.totalorder %s1201_s15, 2 }
  0x10   : > { %p1281_p9 = por %p118_p7, %p36_p0  ;;  %p1285_p10 = por %p124_p8, %p42_p3 }
  0x11   : > { %140 = sbr.rel (%p1949_p11) target bundleno = 129 (0x81), region = 16 }
  0x12   : > { %s1954_s24 = scalar_select %p1281_p9, 1, 0 }
  0x13   : > { %s1955_s25 = scalar_select %p1285_p10, 1, 0 }
  0x18   : > { %143 = sbr.rel (!%p1272_p5) target bundleno = 59 (0x3b), region = 20  ;;  %s144_s26 = sand.u32 (%p1272_p5), 1, %s1197_s14  }
  0x19   : > { %s149_s27 = smul.u32 (%p1272_p5), 13, %s1201_s15  ;;  %s1299_s5 = scalar_lea.sflag (%p1272_p5), [#allocation3], %s144_s26 }
  0x1a   : > { %s941_s28 = smul.u32 (%p1272_p5), 104, %s144_s26 }
  0x1b   : > { %s150_s29 = ssub.s32 (%p1272_p5), 25, %s149_s27 }
  0x1c   : > { %p151_p12 = scmp.lt.s32.totalorder (%p1272_p5), %s150_s29, 13  ;;  %s148_s6 = scalar_lea.vmem (%p1272_p5), [#allocation2], %s941_s28 }
  0x1f   : > { %s1976_s29 = smov (!%p151_p12, %s150_s29), 13 }
  0x20   : > { %s1296_s30 = sshll.u32 %s1976_s29, 7 }
  0x21   : > { %s155_s4 = ssub.s32 1664, %s1296_s30 }
  0x22   : > { %156 = vsyncadd %s1299_s5, %s155_s4  ;;  %p918_p13 = scmp.ne.s32.totalorder %s1296_s30, 0  ;;  %s938_s7 = smul.u32 1664, %s1201_s15 }
  0x23   : > { %s161_s8 = sshll.u32 %s148_s6, 4  ;;  %s1051_s26 = scalar_lea.hbm %s1945_s0, 3200  ;;  %s1309_s8 = int_to_ptr.vmem [resolvable:$true] %s161_s8 }
  0x24   : > { %s1307_s11 = scalar_lea.hbm %s1945_s0, %s938_s7 }
  0x25   : > { %s1047_s17 = scalar_lea.hbm %s1307_s11, %s1296_s30  ;;  %p1052_p3 = scmp.lt.u32.totalorder %s1307_s11, %s1945_s0 }
  0x26   : > { %p1048_p0 = scmp.ne.s32.totalorder %s1307_s11, %s1047_s17  ;;  %p1053_p4 = scmp.lt.u32.totalorder %s1051_s26, %s1047_s17 }
  0x27   : > { %p1055_p8 = scmp.lt.u32.totalorder %s1047_s17, %s1307_s11 }
  0x28   : > { %p1049_p1 = pnand %p1048_p0, %p918_p13  ;;  %p1054_p7 = por %p1053_p4, %p1052_p3 }
  0x2a   : > { %p1050_p2 = pneg %p1049_p1  ;;  %p1056_p12 = por %p1055_p8, %p1054_p7 }
  0x2c   : > { %p1057_p11 = pnand %p1056_p12, %p1050_p2 }
  0x2e   : > { %1060 = shalt.err (!%p1057_p11)
}
  0x2f   : > { %s1061_s29 = scalar_lea.vmem %s1309_s8, %s1296_s30  ;;  %s1203_s4 = smov [#allocation2]  }
  0x30   : > { %p1062_p0 = scmp.ne.s32.totalorder %s1309_s8, %s1061_s29  ;;  %s1065_s6 = sshll.u32 %s1203_s4, 4  ;;  %s1066_s6 = int_to_ptr.vmem [resolvable:$false] %s1065_s6 }
  0x31   : > { %s1067_s7 = scalar_lea.vmem %s1066_s6, 3328  ;;  %p1068_p9 = scmp.lt.s32.totalorder %s1309_s8, %s1066_s6 }
  0x32   : > { %p1063_p1 = pnand %p1062_p0, %p918_p13  ;;  %p1069_p3 = scmp.lt.s32.totalorder %s1067_s7, %s1061_s29 }
  0x34   : > { %p1064_p10 = pneg %p1063_p1  ;;  %p1070_p4 = por %p1069_p3, %p1068_p9 }
  0x36   : > { %p1071_p7 = pnand %p1070_p4, %p1064_p10 }
  0x38   : > { %1074 = shalt.err (!%p1071_p7)
}
  0x39   : > { %s1204_s9 = smov 128   ;;  %s1205_s10 = smov 8  }
  0x3a   : > { %167 = dma.hbm_to_vmem [thread:$0]  (%p918_p13), %s1307_s11, %s1296_s30, %s1309_s8, %s1299_s5, %s1204_s9, %s1204_s9, %s1205_s10  }
  0x3b PF: > { %170 = sbr.rel (!%p1272_p5) target bundleno = 94 (0x5e), region = 24  ;;  %s171_s17 = sand.u32 (%p1272_p5), 1, %s1201_s15  }
  0x3c   : > { %s173_s19 = sand.u32 (%p1272_p5), 1, %s1197_s14   ;;  %s176_s26 = smul.u32 (%p1272_p5), 13, %s1201_s15 }
  0x3d   : > { %s942_s20 = smul.u32 (%p1272_p5), 104, %s173_s19  ;;  %s1344_s4 = scalar_lea.sflag (%p1272_p5), [#allocation6], %s171_s17 }
  0x3e   : > { %s177_s27 = ssub.s32 (%p1272_p5), 25, %s176_s26 }
  0x3f   : > { %p178_p9 = scmp.lt.s32.totalorder (%p1272_p5), %s177_s27, 13  ;;  %s175_s30 = scalar_lea.vmem (%p1272_p5), [#allocation5], %s942_s20 }
  0x42   : > { %s1978_s27 = smov (!%p178_p9, %s177_s27), 13 }
  0x43   : > { %s1341_s28 = sshll.u32 %s1978_s27, 7 }
  0x44   : > { %s182_s29 = ssub.s32 1664, %s1341_s28 }
  0x45   : > { %183 = vsyncadd %s1344_s4, %s182_s29  ;;  %p923_p10 = scmp.ne.s32.totalorder %s1341_s28, 0  ;;  %s939_s5 = smul.u32 1664, %s1201_s15 }
  0x46   : > { %s188_s8 = sshll.u32 %s175_s30, 4  ;;  %s1079_s19 = scalar_lea.hbm %s1946_s1, 3200  ;;  %s1354_s8 = int_to_ptr.vmem [resolvable:$true] %s188_s8 }
  0x47   : > { %s1352_s7 = scalar_lea.hbm %s1946_s1, %s939_s5 }
  0x48   : > { %s1075_s9 = scalar_lea.hbm %s1352_s7, %s1341_s28  ;;  %p1080_p8 = scmp.lt.u32.totalorder %s1352_s7, %s1946_s1 }
  0x49   : > { %p1076_p11 = scmp.ne.s32.totalorder %s1352_s7, %s1075_s9  ;;  %p1081_p12 = scmp.lt.u32.totalorder %s1079_s19, %s1075_s9 }
  0x4a   : > { %p1083_p1 = scmp.lt.u32.totalorder %s1075_s9, %s1352_s7 }
  0x4b   : > { %p1077_p13 = pnand %p1076_p11, %p923_p10  ;;  %p1082_p0 = por %p1081_p12, %p1080_p8 }
  0x4d   : > { %p1078_p2 = pneg %p1077_p13  ;;  %p1084_p3 = por %p1083_p1, %p1082_p0 }
  0x4f   : > { %p1085_p4 = pnand %p1084_p3, %p1078_p2 }
  0x51   : > { %1088 = shalt.err (!%p1085_p4)
}
  0x52   : > { %s1089_s27 = scalar_lea.vmem %s1354_s8, %s1341_s28  ;;  %s1206_s29 = smov [#allocation5]  }
  0x53   : > { %p1090_p7 = scmp.ne.s32.totalorder %s1354_s8, %s1089_s27  ;;  %s1093_s30 = sshll.u32 %s1206_s29, 4  ;;  %s1094_s30 = int_to_ptr.vmem [resolvable:$false] %s1093_s30 }
  0x54   : > { %s1095_s5 = scalar_lea.vmem %s1094_s30, 3328  ;;  %p1096_p13 = scmp.lt.s32.totalorder %s1354_s8, %s1094_s30 }
  0x55   : > { %p1091_p9 = pnand %p1090_p7, %p923_p10  ;;  %p1097_p8 = scmp.lt.s32.totalorder %s1095_s5, %s1089_s27 }
  0x57   : > { %p1092_p11 = pneg %p1091_p9  ;;  %p1098_p12 = por %p1097_p8, %p1096_p13 }
  0x59   : > { %p1099_p0 = pnand %p1098_p12, %p1092_p11 }
  0x5b   : > { %1102 = shalt.err (!%p1099_p0)
}
  0x5c   : > { %s1207_s11 = smov 128   ;;  %s1208_s6 = smov 8  }
  0x5d   : > { %194 = dma.hbm_to_vmem [thread:$0]  (%p923_p10), %s1352_s7, %s1341_s28, %s1354_s8, %s1344_s4, %s1207_s11, %s1207_s11, %s1208_s6  }
  0x5e PF: > { %197 = sbr.rel (!%p1272_p5) target bundleno = 129 (0x81), region = 28  ;;  %s198_s9 = sand.u32 (%p1272_p5), 1, %s1201_s15  }
  0x5f   : > { %s200_s10 = sand.u32 (%p1272_p5), 1, %s1197_s14   ;;  %s203_s19 = smul.u32 (%p1272_p5), 13, %s1201_s15 }
  0x60   : > { %s943_s17 = smul.u32 (%p1272_p5), 104, %s200_s10  ;;  %s1389_s29 = scalar_lea.sflag (%p1272_p5), [#allocation6], %s198_s9 }
  0x61   : > { %s204_s20 = ssub.s32 (%p1272_p5), 25, %s203_s19 }
  0x62   : > { %p205_p2 = scmp.lt.s32.totalorder (%p1272_p5), %s204_s20, 13  ;;  %s202_s28 = scalar_lea.vmem (%p1272_p5), [#allocation7], %s943_s17 }
  0x65   : > { %s1980_s20 = smov (!%p205_p2, %s204_s20), 13 }
  0x66   : > { %s1386_s26 = sshll.u32 %s1980_s20, 7 }
  0x67   : > { %s209_s27 = ssub.s32 1664, %s1386_s26 }
  0x68   : > { %210 = vsyncadd %s1389_s29, %s209_s27  ;;  %p928_p5 = scmp.ne.s32.totalorder %s1386_s26, 0  ;;  %s940_s22 = smul.u32 1664, %s1201_s15 }
  0x69   : > { %s215_s4 = sshll.u32 %s202_s28, 4  ;;  %s1107_s9 = scalar_lea.hbm %s1947_s2, 3200  ;;  %s1399_s4 = int_to_ptr.vmem [resolvable:$true] %s215_s4 }
  0x6a   : > { %s1397_s30 = scalar_lea.hbm %s1947_s2, %s940_s22 }
  0x6b   : > { %s1103_s5 = scalar_lea.hbm %s1397_s30, %s1386_s26  ;;  %p1108_p4 = scmp.lt.u32.totalorder %s1397_s30, %s1947_s2 }
  0x6c   : > { %p1104_p10 = scmp.ne.s32.totalorder %s1397_s30, %s1103_s5  ;;  %p1109_p7 = scmp.lt.u32.totalorder %s1107_s9, %s1103_s5 }
  0x6d   : > { %p1111_p11 = scmp.lt.u32.totalorder %s1103_s5, %s1397_s30 }
  0x6e   : > { %p1105_p1 = pnand %p1104_p10, %p928_p5  ;;  %p1110_p9 = por %p1109_p7, %p1108_p4 }
  0x70   : > { %p1106_p3 = pneg %p1105_p1  ;;  %p1112_p13 = por %p1111_p11, %p1110_p9 }
  0x72   : > { %p1113_p8 = pnand %p1112_p13, %p1106_p3 }
  0x74   : > { %1116 = shalt.err (!%p1113_p8)
}
  0x75   : > { %s1117_s19 = scalar_lea.vmem %s1399_s4, %s1386_s26  ;;  %s1209_s20 = smov [#allocation7]  }
  0x76   : > { %p1118_p12 = scmp.ne.s32.totalorder %s1399_s4, %s1117_s19  ;;  %s1121_s27 = sshll.u32 %s1209_s20, 4  ;;  %s1122_s27 = int_to_ptr.vmem [resolvable:$false] %s1121_s27 }
  0x77   : > { %s1123_s28 = scalar_lea.vmem %s1122_s27, 3328  ;;  %p1124_p10 = scmp.lt.s32.totalorder %s1399_s4, %s1122_s27 }
  0x78   : > { %p1119_p0 = pnand %p1118_p12, %p928_p5  ;;  %p1125_p1 = scmp.lt.s32.totalorder %s1123_s28, %s1117_s19 }
  0x7a   : > { %p1120_p2 = pneg %p1119_p0  ;;  %p1126_p4 = por %p1125_p1, %p1124_p10 }
  0x7c   : > { %p1127_p7 = pnand %p1126_p4, %p1120_p2 }
  0x7e   : > { %1130 = shalt.err (!%p1127_p7)
}
  0x7f   : > { %s1210_s22 = smov 128   ;;  %s1211_s8 = smov 8  }
  0x80   : > { %221 = dma.hbm_to_vmem [thread:$0]  (%p928_p5), %s1397_s30, %s1386_s26, %s1399_s4, %s1389_s29, %s1210_s22, %s1210_s22, %s1211_s8  }
  0x81 PF: > { %p932_p3 = scmp.ge.s32.totalorder %s1201_s15, 1  ;;  %p223_p9 = scmp.lt.s32.totalorder %s1201_s15, 3 }
  0x83   : > { %p224_p11 = pnand %p932_p3, %p223_p9 }
  0x84   : > { %s1429_s7 = sand.u32 (!%p224_p11), 1, %s1193_s13  }
  0x85   : > { %227 = sbr.rel (%p224_p11) target bundleno = 596 (0x254), region = 32  ;;  %s230_s11 = scalar_lea.sflag (!%p224_p11), [#allocation3], %s1429_s7 }
  0x86   : > { %s944_s5 = smul.u32 (!%p224_p11), 104, %s1429_s7 }
  0x88   : > { %s1433_s6 = scalar_lea.vmem (!%p224_p11), [#allocation2], %s944_s5 }
  0x8c   : > { %1176 = dma.done.wait (%p1276_p6), %s230_s11, 1664  }
  0x8d   : > { %1178 = vsyncadd (%p1276_p6), %s230_s11, 4294965632  ;;  %s238_s26 = sand.u32 1, %s1254_s16   ;;  %s1440_s4 = scalar_lea.vmem [#allocation5], %s944_s5 }
  0x8e   : > { %s239_s29 = scalar_lea.sflag [#allocation6], %s238_s26 }
  0x8f   : > { %1180 = dma.done.wait (%p1276_p6), %s239_s29, 3328  }
  0x90   : > { %1182 = vsyncadd (%p1276_p6), %s239_s29, 4294963968  ;;  %v299_v0 = vld [vmem:[%s1433_s6] sm:$0xff]  ;;  %s1447_s30 = scalar_lea.vmem [#allocation7], %s944_s5  ;;  %v312_v2 = vld [vmem:[%s1440_s4] sm:$0xff]  ;;  %s703_s23 = smul.u32 104, %s1254_s16 }
  0x91   : > { %v481_v1 = vld [vmem:[%s1447_s30] sm:$0xff]  ;;  %v325_v4 = vsub.f32 %v299_v0, %v312_v2  ;;  %v300_v5 = vld [vmem:[%s1433_s6 + $0x8] sm:$0xff]  ;;  %v313_v7 = vld [vmem:[%s1440_s4 + $0x8] sm:$0xff]  ;;  %s933_s9 = sshll.u32 %s1429_s7, 3  ;;  %s935_s10 = sshll.u32 %s1254_s16, 7 }
  0x92   : > { %v494_v3 = vsub.f32 %v299_v0, %v481_v1  ;;  %v482_v6 = vld [vmem:[%s1447_s30 + $0x8] sm:$0xff]  ;;  %v326_v9 = vsub.f32 %v300_v5, %v313_v7  ;;  %v301_v10 = vld [vmem:[%s1433_s6 + $0x10] sm:$0xff]  ;;  %v314_v12 = vld [vmem:[%s1440_s4 + $0x10] sm:$0xff]  ;;  %s283_s17 = scalar_lea.vmem [#allocation8], %s933_s9  ;;  %s1901_s22 = scalar_lea.hbm %s1948_s3, %s935_s10 }
  0x93   : > { %v495_v8 = vsub.f32 %v300_v5, %v482_v6  ;;  %v483_v11 = vld [vmem:[%s1447_s30 + $0x10] sm:$0xff]  ;;  %v338_v14 = vadd.f32 1e-06, %v325_v4  ;;  %v327_v16 = vsub.f32 %v301_v10, %v314_v12  ;;  %v302_v17 = vld [vmem:[%s1433_s6 + $0x18] sm:$0xff]  ;;  %v315_v21 = vld [vmem:[%s1440_s4 + $0x18] sm:$0xff]  ;;  %s801_s19 = sshll.u32 %s283_s17, 4  ;;  %s1903_s19 = int_to_ptr.vmem [resolvable:$true] %s801_s19 }
  0x94   : > { %v507_v13 = vadd.f32 1e-06, %v494_v3  ;;  %v496_v15 = vsub.f32 %v301_v10, %v483_v11  ;;  %v484_v18 = vld [vmem:[%s1447_s30 + $0x18] sm:$0xff]  ;;  %v339_v20 = vadd.f32 1e-06, %v326_v9  ;;  %v328_v29 = vsub.f32 %v302_v17, %v315_v21  ;;  %v303_v30 = vld [vmem:[%s1433_s6 + $0x20] sm:$0xff] }
  0x95   : > { %v508_v19 = vadd.f32 1e-06, %v495_v8  ;;  %v351_v23 = vmul.f32 %v338_v14, %v338_v14  ;;  %v497_v25 = vsub.f32 %v302_v17, %v484_v18  ;;  %v340_v28 = vadd.f32 1e-06, %v327_v16  ;;  %v485_v31 = vld [vmem:[%s1447_s30 + $0x20] sm:$0xff]  ;;  %v316_v32 = vld [vmem:[%s1440_s4 + $0x20] sm:$0xff] }
  0x96   : > { %v520_v22 = vmul.f32 %v507_v13, %v507_v13  ;;  %v509_v24 = vadd.f32 1e-06, %v496_v15  ;;  %v352_v27 = vmul.f32 %v339_v20, %v339_v20  ;;  %v341_v36 = vadd.f32 1e-06, %v328_v29  ;;  %v304_v39 = vld [vmem:[%s1433_s6 + $0x28] sm:$0xff]  ;;  %v317_v41 = vld [vmem:[%s1440_s4 + $0x28] sm:$0xff] }
  0x97   : > { %364 = vadd.xlane.f32.xlu0 %v351_v23  ;;  %v521_v26 = vmul.f32 %v508_v19, %v508_v19  ;;  %v510_v34 = vadd.f32 1e-06, %v497_v25  ;;  %v353_v35 = vmul.f32 %v340_v28, %v340_v28  ;;  %v498_v37 = vsub.f32 %v303_v30, %v485_v31  ;;  %v486_v40 = vld [vmem:[%s1447_s30 + $0x28] sm:$0xff]  ;;  %v305_v44 = vld [vmem:[%s1433_s6 + $0x30] sm:$0xff]  ;;  %v318_v50 = vld [vmem:[%s1440_s4 + $0x30] sm:$0xff]  ;;  %s788_s8 = scalar_lea.sflag [#allocation4], %s1429_s7 }
  0x98   : > { %533 = vadd.xlane.f32.xlu1 %v520_v22  ;;  %v522_v33 = vmul.f32 %v509_v24, %v509_v24  ;;  %v329_v38 = vsub.f32 %v303_v30, %v316_v32  ;;  %v499_v43 = vsub.f32 %v304_v39, %v486_v40  ;;  %v354_v45 = vmul.f32 %v341_v36, %v341_v36  ;;  %v487_v49 = vld [vmem:[%s1447_s30 + $0x30] sm:$0xff]  ;;  %v306_v57 = vld [vmem:[%s1433_s6 + $0x38] sm:$0xff]  ;;  %v319_v59 = vld [vmem:[%s1440_s4 + $0x38] sm:$0xff]  ;;  %s1131_s5 = scalar_lea.vmem %s1903_s19, 128  ;;  %p1968_p5 = scmp.ne.s32.totalorder %s1954_s24, 0 }
  0x99   : > { %v523_v42 = vmul.f32 %v510_v34, %v510_v34  ;;  %v511_v46 = vadd.f32 1e-06, %v498_v37  ;;  %v330_v48 = vsub.f32 %v304_v39, %v317_v41  ;;  %v500_v51 = vsub.f32 %v305_v44, %v487_v49  ;;  %v488_v58 = vld [vmem:[%s1447_s30 + $0x38] sm:$0xff]  ;;  %v307_v2 = vld [vmem:[%s1433_s6 + $0x40] sm:$0xff]  ;;  %v320_v4 = vld [vmem:[%s1440_s4 + $0x40] sm:$0xff]  ;;  %p1132_p6 = scmp.ne.s32.totalorder %s1903_s19, %s1131_s5  ;;  %s1212_s16 = smov [#allocation8]  }
  0x9a   : > { %v342_v47 = vadd.f32 1e-06, %v329_v38  ;;  %v331_v52 = vsub.f32 %v305_v44, %v318_v50  ;;  %v512_v55 = vadd.f32 1e-06, %v499_v43  ;;  %v501_v61 = vsub.f32 %v306_v57, %v488_v58  ;;  %v489_v3 = vld [vmem:[%s1447_s30 + $0x40] sm:$0xff]  ;;  %v308_v11 = vld [vmem:[%s1433_s6 + $0x48] sm:$0xff] }
  0x9b   : > { %366 = vadd.xlane.f32.xlu0 %v352_v27  ;;  %v524_v53 = vmul.f32 %v511_v46, %v511_v46  ;;  %v343_v56 = vadd.f32 1e-06, %v330_v48  ;;  %v513_v60 = vadd.f32 1e-06, %v500_v51  ;;  %v332_v1 = vsub.f32 %v306_v57, %v319_v59  ;;  %v490_v12 = vld [vmem:[%s1447_s30 + $0x48] sm:$0xff]  ;;  %v321_v13 = vld [vmem:[%s1440_s4 + $0x48] sm:$0xff]  ;;  %p1133_p13 = pnand %p1132_p6, %p1968_p5 }
  0x9c   : > { %535 = vadd.xlane.f32.xlu1 %v521_v26  ;;  %v355_v54 = vmul.f32 %v342_v47, %v342_v47  ;;  %v525_v62 = vmul.f32 %v512_v55, %v512_v55  ;;  %v344_v0 = vadd.f32 1e-06, %v331_v52  ;;  %v514_v6 = vadd.f32 1e-06, %v501_v61  ;;  %v309_v16 = vld [vmem:[%s1433_s6 + $0x50] sm:$0xff]  ;;  %v322_v22 = vld [vmem:[%s1440_s4 + $0x50] sm:$0xff] }
  0x9d   : > { %v356_v63 = vmul.f32 %v343_v56, %v343_v56  ;;  %v526_v5 = vmul.f32 %v513_v60, %v513_v60  ;;  %v345_v8 = vadd.f32 1e-06, %v332_v1  ;;  %v502_v9 = vsub.f32 %v307_v2, %v489_v3  ;;  %v491_v21 = vld [vmem:[%s1447_s30 + $0x50] sm:$0xff]  ;;  %v310_v29 = vld [vmem:[%s1433_s6 + $0x58] sm:$0xff]  ;;  %v323_v31 = vld [vmem:[%s1440_s4 + $0x58] sm:$0xff]  ;;  %p1134_p8 = pneg %p1133_p13  ;;  %s1135_s11 = sshll.u32 %s1212_s16, 4  ;;  %s1136_s11 = int_to_ptr.vmem [resolvable:$false] %s1135_s11 }
  0x9e   : > { %v357_v7 = vmul.f32 %v344_v0, %v344_v0  ;;  %v333_v10 = vsub.f32 %v307_v2, %v320_v4  ;;  %v527_v14 = vmul.f32 %v514_v6, %v514_v6  ;;  %v503_v15 = vsub.f32 %v308_v11, %v490_v12  ;;  %v492_v30 = vld [vmem:[%s1447_s30 + $0x58] sm:$0xff]  ;;  %v311_v38 = vld [vmem:[%s1433_s6 + $0x60] sm:$0xff]  ;;  %v324_v40 = vld [vmem:[%s1440_s4 + $0x60] sm:$0xff]  ;;  %s1137_s6 = scalar_lea.vmem %s1136_s11, 256  ;;  %p1138_p12 = scmp.lt.s32.totalorder %s1903_s19, %s1136_s11 }
  0x9f   : > { %368 = vadd.xlane.f32.xlu0 %v353_v35  ;;  %v358_v17 = vmul.f32 %v345_v8, %v345_v8  ;;  %v515_v18 = vadd.f32 1e-06, %v502_v9  ;;  %v334_v20 = vsub.f32 %v308_v11, %v321_v13  ;;  %v504_v23 = vsub.f32 %v309_v16, %v491_v21  ;;  %v493_v39 = vld [vmem:[%s1447_s30 + $0x60] sm:$0xff]  ;;  %p1139_p0 = scmp.lt.s32.totalorder %s1137_s6, %s1131_s5 }
  0xa0   : > { %537 = vadd.xlane.f32.xlu1 %v522_v33  ;;  %v346_v19 = vadd.f32 1e-06, %v333_v10  ;;  %v335_v24 = vsub.f32 %v309_v16, %v322_v22  ;;  %v516_v27 = vadd.f32 1e-06, %v503_v15  ;;  %v505_v33 = vsub.f32 %v310_v29, %v492_v30 }
  0xa1   : > { %v528_v25 = vmul.f32 %v515_v18, %v515_v18  ;;  %v347_v28 = vadd.f32 1e-06, %v334_v20  ;;  %v517_v32 = vadd.f32 1e-06, %v504_v23  ;;  %v336_v37 = vsub.f32 %v310_v29, %v323_v31  ;;  %p1140_p2 = por %p1139_p0, %p1138_p12 }
  0xa2   : > { %v359_v26 = vmul.f32 %v346_v19, %v346_v19  ;;  %v529_v34 = vmul.f32 %v516_v27, %v516_v27  ;;  %v348_v36 = vadd.f32 1e-06, %v335_v24  ;;  %v337_v46 = vsub.f32 %v311_v38, %v324_v40 }
  0xa3   : > { %370 = vadd.xlane.f32.xlu0 %v354_v45  ;;  %v360_v35 = vmul.f32 %v347_v28, %v347_v28  ;;  %v530_v41 = vmul.f32 %v517_v32, %v517_v32  ;;  %v349_v44 = vadd.f32 1e-06, %v336_v37  ;;  %v506_v45 = vsub.f32 %v311_v38, %v493_v39  ;;  %p1141_p10 = pnand %p1140_p2, %p1134_p8 }
  0xa4   : > { %539 = vadd.xlane.f32.xlu1 %v523_v42  ;;  %v518_v42 = vadd.f32 1e-06, %v505_v33  ;;  %v361_v43 = vmul.f32 %v348_v36, %v348_v36  ;;  %v350_v50 = vadd.f32 1e-06, %v337_v46  ;;  %v704_v57 = vstv %s703_s23 }
  0xa5   : > { %v362_v48 = vmul.f32 %v349_v44, %v349_v44  ;;  %v519_v49 = vadd.f32 1e-06, %v506_v45 }
  0xa6   : > { %v531_v47 = vmul.f32 %v518_v42, %v518_v42  ;;  %v363_v52 = vmul.f32 %v350_v50, %v350_v50 }
  0xa7   : > { %372 = vadd.xlane.f32.xlu0 %v355_v54  ;;  %v532_v51 = vmul.f32 %v519_v49, %v519_v49 }
  0xa8   : > { %541 = vadd.xlane.f32.xlu1 %v524_v53  ;;  %v689_v53 = vlaneseq }
  0xaa   : > { %v1491_v56 = vshrl.u32 %v689_v53, 7 }
  0xab   : > { %374 = vadd.xlane.f32.xlu0 %v356_v63 }
  0xac   : > { %543 = vadd.xlane.f32.xlu1 %v525_v62  ;;  %v691_v58 = vadd.s32 8, %v1491_v56  ;;  %v692_v59 = vadd.s32 16, %v1491_v56  ;;  %v693_v62 = vadd.s32 24, %v1491_v56  ;;  %v694_v63 = vadd.s32 32, %v1491_v56 }
  0xad   : > { %v695_v0 = vadd.s32 40, %v1491_v56  ;;  %v696_v1 = vadd.s32 48, %v1491_v56  ;;  %v697_v2 = vadd.s32 56, %v1491_v56  ;;  %v698_v3 = vadd.s32 64, %v1491_v56 }
  0xae   : > { %v699_v4 = vadd.s32 72, %v1491_v56  ;;  %v701_v6 = vadd.s32 88, %v1491_v56  ;;  %v1513_v8 = vadd.s32 %v704_v57, %v1491_v56  ;;  %v1515_v9 = vadd.s32 %v704_v57, %v691_v58 }
  0xaf   : > { %376 = vadd.xlane.f32.xlu0 %v357_v7  ;;  %v702_v7 = vadd.s32 96, %v1491_v56  ;;  %v1517_v10 = vadd.s32 %v704_v57, %v692_v59  ;;  %v1523_v13 = vadd.s32 %v704_v57, %v693_v62  ;;  %v1527_v15 = vadd.s32 %v704_v57, %v695_v0 }
  0xb0   : > { %545 = vadd.xlane.f32.xlu1 %v526_v5  ;;  %v700_v5 = vadd.s32 80, %v1491_v56  ;;  %v1529_v16 = vadd.s32 %v704_v57, %v696_v1  ;;  %v1534_v18 = vadd.s32 %v704_v57, %v698_v3  ;;  %v1536_v19 = vadd.s32 %v704_v57, %v699_v4 }
  0xb1   : > { %v1541_v21 = vadd.s32 %v704_v57, %v701_v6  ;;  %v1543_v22 = vadd.s32 %v704_v57, %v702_v7  ;;  %vm718_vm10 = vcmp.lt.s32.totalorder %v1513_v8, 200  ;;  %vm719_vm12 = vcmp.lt.s32.totalorder %v1515_v9, 200 }
  0xb2   : > { %v1539_v20 = vadd.s32 %v704_v57, %v700_v5 }
  0xb3   : > { %378 = vadd.xlane.f32.xlu0 %v358_v17  ;;  %v1532_v17 = vadd.s32 %v704_v57, %v697_v2 }
  0xb4   : > { %547 = vadd.xlane.f32.xlu1 %v527_v14  ;;  %v1525_v14 = vadd.s32 %v704_v57, %v694_v63 }
  0xb7   : > { %380 = vadd.xlane.f32.xlu0 %v359_v26 }
  0xb8   : > { %549 = vadd.xlane.f32.xlu1 %v528_v25 }
  0xbb   : > { %382 = vadd.xlane.f32.xlu0 %v360_v35 }
  0xbc   : > { %551 = vadd.xlane.f32.xlu1 %v529_v34 }
  0xbf   : > { %384 = vadd.xlane.f32.xlu0 %v361_v43 }
  0xc0   : > { %553 = vadd.xlane.f32.xlu1 %v530_v41 }
  0xc3   : > { %386 = vadd.xlane.f32.xlu0 %v362_v48 }
  0xc4   : > { %555 = vadd.xlane.f32.xlu1 %v531_v47 }
  0xc7   : > { %388 = vadd.xlane.f32.xlu0 %v363_v52 }
  0xc8   : > { %557 = vadd.xlane.f32.xlu1 %v532_v51 }
 0x124   : > { %v1488_v55 = vpop.xlane.xlu0 %364 }
 0x125   : > { %v534_v54 = vpop.xlane.xlu1 %533  ;;  %vm392_vm2 = vcmp.eq.f32.partialorder %v1488_v55, inf  ;;  %vm394_vm3 = vcmp.eq.f32.partialorder %v1488_v55, 0.0  ;;  %v395_v27 = vand.u32 2147483648, %v1488_v55 }
 0x126   : > { %995 = vrsqrt.f32 %v534_v54  ;;  %vm561_vm0 = vcmp.eq.f32.partialorder %v534_v54, inf  ;;  %vm563_vm1 = vcmp.eq.f32.partialorder %v534_v54, 0.0  ;;  %v564_v24 = vand.u32 2147483648, %v534_v54 }
 0x127   : > { %997 = vrsqrt.f32 %v1488_v55 }
 0x128   : > { %v1498_v61 = vpop.xlane.xlu0 %366 }
 0x129   : > { %v1496_v60 = vpop.xlane.xlu1 %535  ;;  %vm399_vm6 = vcmp.eq.f32.partialorder %v1498_v61, inf  ;;  %vm401_vm7 = vcmp.eq.f32.partialorder %v1498_v61, 0.0  ;;  %v402_v36 = vand.u32 2147483648, %v1498_v61 }
 0x12a   : > { %999 = vrsqrt.f32 %v1496_v60  ;;  %vm568_vm4 = vcmp.eq.f32.partialorder %v1496_v60, inf  ;;  %vm570_vm5 = vcmp.eq.f32.partialorder %v1496_v60, 0.0  ;;  %v571_v31 = vand.u32 2147483648, %v1496_v60 }
 0x12b   : > { %1001 = vrsqrt.f32 %v1498_v61 }
 0x12c   : > { %v1521_v12 = vpop.xlane.xlu0 %368 }
 0x12d   : > { %v1519_v11 = vpop.xlane.xlu1 %537  ;;  %vm406_vm11 = vcmp.eq.f32.partialorder %v1521_v12, inf  ;;  %vm408_vm13 = vcmp.eq.f32.partialorder %v1521_v12, 0.0  ;;  %v409_v46 = vand.u32 2147483648, %v1521_v12 }
 0x12e   : > { %1003 = vrsqrt.f32 %v1519_v11  ;;  %vm575_vm8 = vcmp.eq.f32.partialorder %v1519_v11, inf  ;;  %vm577_vm9 = vcmp.eq.f32.partialorder %v1519_v11, 0.0  ;;  %v578_v40 = vand.u32 2147483648, %v1519_v11 }
 0x12f   : > { %1005 = vrsqrt.f32 %v1521_v12 }
 0x130   : > { %v996_v23 = vpop.eup %995  ;;  %v1551_v29 = vpop.xlane.xlu0 %370 }
 0x131   : > { %v998_v25 = vpop.eup %997  ;;  %v560_v26 = vmul.f32 %v996_v23, %v534_v54  ;;  %v1549_v28 = vpop.xlane.xlu1 %539  ;;  %v416_v62 = vand.u32 2147483648, %v1551_v29 }
 0x132   : > { %v391_v30 = vmul.f32 %v998_v25, %v1488_v55  ;;  %1007 = vrsqrt.f32 %v1549_v28  ;;  %vm582_vm14 = vcmp.eq.f32.partialorder %v1549_v28, inf  ;;  %vm584_vm15 = vcmp.eq.f32.partialorder %v1549_v28, 0.0 }
 0x133   : > { %v562_v32 = vsel %vm561_vm0, %v534_v54, %v560_v26  ;;  %1009 = vrsqrt.f32 %v1551_v29  ;;  %vm1951_vm0 = vcmask 7168  }
 0x134   : > { %v1000_v33 = vpop.eup %999  ;;  %v565_v34 = vsel %vm563_vm1, %v564_v24, %v562_v32  ;;  %v393_v35 = vsel %vm392_vm2, %v1488_v55, %v391_v30  ;;  %v1573_v42 = vpop.xlane.xlu0 %372  ;;  %v585_v55 = vand.u32 2147483648, %v1549_v28  ;;  %vm720_vm1 = vcmp.lt.s32.totalorder %v1517_v10, 200 }
 0x135   : > { %v1002_v37 = vpop.eup %1001  ;;  %v396_v38 = vsel %vm394_vm3, %v395_v27, %v393_v35  ;;  %v567_v39 = vmul.f32 %v1000_v33, %v1496_v60  ;;  %v1571_v41 = vpop.xlane.xlu1 %541  ;;  %vm413_vm2 = vcmp.eq.f32.partialorder %v1551_v29, inf  ;;  %vm415_vm3 = vcmp.eq.f32.partialorder %v1551_v29, 0.0 }
 0x136   : > { %v650_v43 = vsub.f32 %v396_v38, %v565_v34  ;;  %v398_v44 = vmul.f32 %v1002_v37, %v1498_v61  ;;  %1011 = vrsqrt.f32 %v1571_v41  ;;  %v592_v26 = vand.u32 2147483648, %v1571_v41 }
 0x137   : > { %v569_v45 = vsel %vm568_vm4, %v1496_v60, %v567_v39  ;;  %1013 = vrsqrt.f32 %v1573_v42  ;;  %vm589_vm4 = vcmp.eq.f32.partialorder %v1571_v41, inf  ;;  %v423_v33 = vand.u32 2147483648, %v1573_v42 }
 0x138   : > { %v1004_v47 = vpop.eup %1003  ;;  %v572_v48 = vsel %vm570_vm5, %v571_v31, %v569_v45  ;;  %v400_v49 = vsel %vm399_vm6, %v1498_v61, %v398_v44  ;;  %v663_v51 = vadd.f32 1.0, %v650_v43  ;;  %v1599_v58 = vpop.xlane.xlu0 %374  ;;  %vm591_vm5 = vcmp.eq.f32.partialorder %v1571_v41, 0.0 }
 0x139   : > { %v1006_v50 = vpop.eup %1005  ;;  %v403_v52 = vsel %vm401_vm7, %v402_v36, %v400_v49  ;;  %v574_v54 = vmul.f32 %v1004_v47, %v1519_v11  ;;  %v1597_v57 = vpop.xlane.xlu1 %543  ;;  %vm721_vm6 = vcmp.lt.s32.totalorder %v1523_v13, 200  ;;  %vm420_vm7 = vcmp.eq.f32.partialorder %v1573_v42, inf }
 0x13a   : > { %v651_v59 = vsub.f32 %v403_v52, %v572_v48  ;;  %v405_v60 = vmul.f32 %v1006_v50, %v1521_v12  ;;  %1015 = vrsqrt.f32 %v1597_v57  ;;  %v676_v4 = vmax.f32 %v663_v51, 0.0 }
 0x13b   : > { %v576_v61 = vsel %vm575_vm8, %v1519_v11, %v574_v54  ;;  %1017 = vrsqrt.f32 %v1599_v58  ;;  %vm422_vm8 = vcmp.eq.f32.partialorder %v1573_v42, 0.0 }
 0x13c   : > { %v1008_v63 = vpop.eup %1007  ;;  %v664_v0 = vadd.f32 1.0, %v651_v59  ;;  %v579_v1 = vsel %vm577_vm9, %v578_v40, %v576_v61  ;;  %v407_v2 = vsel %vm406_vm11, %v1521_v12, %v405_v60  ;;  %v1623_v23 = vpop.xlane.xlu0 %376  ;;  %v731_v35 = vsel %vm718_vm10, %v676_v4, 0.0 }
 0x13d   : > { %v1010_v3 = vpop.eup %1009  ;;  %v410_v5 = vsel %vm408_vm13, %v409_v46, %v407_v2  ;;  %v581_v6 = vmul.f32 %v1008_v63, %v1549_v28  ;;  %v1621_v7 = vpop.xlane.xlu1 %545  ;;  %vm596_vm9 = vcmp.eq.f32.partialorder %v1597_v57, inf  ;;  %vm598_vm10 = vcmp.eq.f32.partialorder %v1597_v57, 0.0 }
 0x13e   : > { %v677_v11 = vmax.f32 %v664_v0, 0.0  ;;  %v652_v24 = vsub.f32 %v410_v5, %v579_v1  ;;  %v412_v25 = vmul.f32 %v1010_v3, %v1551_v29  ;;  %1019 = vrsqrt.f32 %v1621_v7 }
 0x13f   : > { %v583_v27 = vsel %vm582_vm14, %v1549_v28, %v581_v6  ;;  %1021 = vrsqrt.f32 %v1623_v23  ;;  %v745_v46 = vsel %vm1951_vm0, %v731_v35, 0.0  ;;  %vm722_vm11 = vcmp.lt.s32.totalorder %v1525_v14, 200 }
 0x140   : > { %v1012_v12 = vpop.eup %1011  ;;  %v665_v30 = vadd.f32 1.0, %v652_v24  ;;  %v586_v31 = vsel %vm584_vm15, %v585_v55, %v583_v27  ;;  %v414_v32 = vsel %vm413_vm2, %v1551_v29, %v412_v25  ;;  %v1648_v28 = vpop.xlane.xlu0 %378  ;;  %v732_v39 = vsel %vm719_vm12, %v677_v11, 0.0 }
 0x141   : > { %v1014_v34 = vpop.eup %1013  ;;  %v417_v36 = vsel %vm415_vm3, %v416_v62, %v414_v32  ;;  %v588_v37 = vmul.f32 %v1012_v12, %v1571_v41  ;;  %v1646_v38 = vpop.xlane.xlu1 %547  ;;  %v599_v29 = vand.u32 2147483648, %v1597_v57  ;;  %v746_v49 = vsel %vm1951_vm0, %v732_v39, 0.0 }
 0x142   : > { %v678_v40 = vmax.f32 %v665_v30, 0.0  ;;  %v653_v43 = vsub.f32 %v417_v36, %v586_v31  ;;  %v419_v44 = vmul.f32 %v1014_v34, %v1573_v42  ;;  %vm427_vm12 = vcmp.eq.f32.partialorder %v1599_v58, inf }
 0x143   : > { %v590_v8 = vsel %vm589_vm4, %v1571_v41, %v588_v37  ;;  %vm429_vm13 = vcmp.eq.f32.partialorder %v1599_v58, 0.0  ;;  %vm603_vm14 = vcmp.eq.f32.partialorder %v1621_v7, inf  ;;  %1023 = vrsqrt.f32 %v1646_v38 }
 0x144   : > { %v1016_v45 = vpop.eup %1015  ;;  %v666_v47 = vadd.f32 1.0, %v653_v43  ;;  %v593_v9 = vsel %vm591_vm5, %v592_v26, %v590_v8  ;;  %v421_v48 = vsel %vm420_vm7, %v1573_v42, %v419_v44  ;;  %v733_v50 = vsel %vm720_vm1, %v678_v40, 0.0  ;;  %v1674_v41 = vpop.xlane.xlu0 %380 }
 0x145   : > { %v424_v51 = vsel %vm422_vm8, %v423_v33, %v421_v48  ;;  %v595_v52 = vmul.f32 %v1016_v45, %v1597_v57  ;;  %v1672_v54 = vpop.xlane.xlu1 %549  ;;  %v1018_v60 = vpop.eup %1017  ;;  %v430_v42 = vand.u32 2147483648, %v1599_v58  ;;  %v747_v61 = vadd.f32 %v746_v49, %v745_v46 }
 0x146   : > { %v679_v55 = vmax.f32 %v666_v47, 0.0  ;;  %v654_v59 = vsub.f32 %v424_v51, %v593_v9  ;;  %v748_v62 = vsel %vm1951_vm0, %v733_v50, 0.0  ;;  %v426_v0 = vmul.f32 %v1018_v60, %v1599_v58 }
 0x147   : > { %v597_v10 = vsel %vm596_vm9, %v1597_v57, %v595_v52  ;;  %vm605_vm15 = vcmp.eq.f32.partialorder %v1621_v7, 0.0  ;;  %v606_v3 = vand.u32 2147483648, %v1621_v7  ;;  %1025 = vrsqrt.f32 %v1648_v28 }
 0x148   : > { %v667_v63 = vadd.f32 1.0, %v654_v59  ;;  %v1020_v1 = vpop.eup %1019  ;;  %v600_v2 = vsel %vm598_vm10, %v599_v29, %v597_v10  ;;  %v1693_v5 = vpop.xlane.xlu0 %382  ;;  %v734_v6 = vsel %vm721_vm6, %v679_v55, 0.0  ;;  %v428_v11 = vsel %vm427_vm12, %v1599_v58, %v426_v0 }
 0x149   : > { %v1691_v4 = vpop.xlane.xlu1 %551  ;;  %v602_v57 = vmul.f32 %v1020_v1, %v1621_v7  ;;  %vm434_vm1 = vcmp.eq.f32.partialorder %v1623_v23, inf  ;;  %v1702_v24 = vadd.f32 %v748_v62, %v747_v61  ;;  %v431_v25 = vsel %vm429_vm13, %v430_v42, %v428_v11  ;;  %v1022_v30 = vpop.eup %1021 }
 0x14a   : > { %vm436_vm2 = vcmp.eq.f32.partialorder %v1623_v23, 0.0  ;;  %1027 = vrsqrt.f32 %v1672_v54  ;;  %v680_v26 = vmax.f32 %v667_v63, 0.0  ;;  %v655_v13 = vsub.f32 %v431_v25, %v600_v2 }
 0x14b   : > { %v604_v27 = vsel %vm603_vm14, %v1621_v7, %v602_v57  ;;  %v437_v12 = vand.u32 2147483648, %v1623_v23  ;;  %v1713_v31 = vsel %vm1951_vm0, %v734_v6, 0.0  ;;  %vm610_vm3 = vcmp.eq.f32.partialorder %v1646_v38, inf }
 0x14c   : > { %vm612_vm4 = vcmp.eq.f32.partialorder %v1646_v38, 0.0  ;;  %1029 = vrsqrt.f32 %v1674_v41  ;;  %v1720_v32 = vpop.xlane.xlu0 %384  ;;  %v433_v33 = vmul.f32 %v1022_v30, %v1623_v23  ;;  %v613_v34 = vand.u32 2147483648, %v1646_v38 }
 0x14d   : > { %v1718_v58 = vpop.xlane.xlu1 %553  ;;  %vm441_vm5 = vcmp.eq.f32.partialorder %v1648_v28, inf  ;;  %vm443_vm6 = vcmp.eq.f32.partialorder %v1648_v28, 0.0  ;;  %v1726_v35 = vadd.f32 1.0, %v655_v13  ;;  %v607_v36 = vsel %vm605_vm15, %v606_v3, %v604_v27  ;;  %v1024_v43 = vpop.eup %1023 }
 0x14e   : > { %v444_v37 = vand.u32 2147483648, %v1648_v28  ;;  %1031 = vrsqrt.f32 %v1691_v4  ;;  %v1734_v39 = vsel %vm722_vm11, %v680_v26, 0.0  ;;  %v435_v40 = vsel %vm434_vm1, %v1623_v23, %v433_v33 }
 0x14f   : > { %vm617_vm7 = vcmp.eq.f32.partialorder %v1672_v54, inf  ;;  %1033 = vrsqrt.f32 %v1693_v5  ;;  %v438_v7 = vsel %vm436_vm2, %v437_v12, %v435_v40  ;;  %vm619_vm8 = vcmp.eq.f32.partialorder %v1672_v54, 0.0 }
 0x150   : > { %v620_v44 = vand.u32 2147483648, %v1672_v54  ;;  %vm448_vm9 = vcmp.eq.f32.partialorder %v1674_v41, inf  ;;  %v1748_v8 = vpop.xlane.xlu0 %386  ;;  %v656_v29 = vsub.f32 %v438_v7, %v607_v36  ;;  %v609_v45 = vmul.f32 %v1024_v43, %v1646_v38 }
 0x151   : > { %v1746_v14 = vpop.xlane.xlu1 %555  ;;  %vm450_vm10 = vcmp.eq.f32.partialorder %v1674_v41, 0.0  ;;  %1035 = vrsqrt.f32 %v1718_v58  ;;  %v1026_v46 = vpop.eup %1025  ;;  %v681_v23 = vmax.f32 %v1726_v35, 0.0  ;;  %v451_v47 = vand.u32 2147483648, %v1674_v41 }
 0x152   : > { %vm624_vm11 = vcmp.eq.f32.partialorder %v1691_v4, inf  ;;  %1037 = vrsqrt.f32 %v1720_v32  ;;  %v611_v9 = vsel %vm610_vm3, %v1646_v38, %v609_v45  ;;  %v440_v48 = vmul.f32 %v1026_v46, %v1648_v28 }
 0x153   : > { %vm626_vm12 = vcmp.eq.f32.partialorder %v1691_v4, 0.0  ;;  %v627_v49 = vand.u32 2147483648, %v1691_v4  ;;  %vm455_vm13 = vcmp.eq.f32.partialorder %v1693_v5, inf  ;;  %vm723_vm14 = vcmp.lt.s32.totalorder %v1527_v15, 200 }
 0x154   : > { %v1028_v50 = vpop.eup %1027  ;;  %v1765_v51 = vadd.f32 1.0, %v656_v29  ;;  %v614_v52 = vsel %vm612_vm4, %v613_v34, %v611_v9  ;;  %vm457_vm15 = vcmp.eq.f32.partialorder %v1693_v5, 0.0  ;;  %v458_v55 = vand.u32 2147483648, %v1693_v5  ;;  %v1787_v63 = vpop.xlane.xlu0 %388 }
 0x155   : > { %1039 = vrsqrt.f32 %v1746_v14  ;;  %v1772_v59 = vpop.xlane.xlu1 %557  ;;  %vm724_vm1 = vcmp.lt.s32.totalorder %v1529_v16, 200  ;;  %v442_v60 = vsel %vm441_vm5, %v1648_v28, %v440_v48  ;;  %v616_v10 = vmul.f32 %v1028_v50, %v1672_v54 }
 0x156   : > { %vm631_vm2 = vcmp.eq.f32.partialorder %v1718_v58, inf  ;;  %v634_v38 = vand.u32 2147483648, %v1718_v58  ;;  %v1030_v42 = vpop.eup %1029  ;;  %v445_v61 = vsel %vm443_vm6, %v444_v37, %v442_v60  ;;  %vm633_vm3 = vcmp.eq.f32.partialorder %v1718_v58, 0.0 }
 0x157   : > { %vm462_vm4 = vcmp.eq.f32.partialorder %v1720_v32, inf  ;;  %v465_v62 = vand.u32 2147483648, %v1720_v32  ;;  %1041 = vrsqrt.f32 %v1748_v8  ;;  %v657_v0 = vsub.f32 %v445_v61, %v614_v52 }
 0x158   : > { %v618_v1 = vsel %vm617_vm7, %v1672_v54, %v616_v10  ;;  %v447_v2 = vmul.f32 %v1030_v42, %v1674_v41  ;;  %vm464_vm5 = vcmp.eq.f32.partialorder %v1720_v32, 0.0  ;;  %1043 = vrsqrt.f32 %v1772_v59  ;;  %v1032_v28 = vpop.eup %1031 }
 0x159   : > { %vm725_vm6 = vcmp.lt.s32.totalorder %v1532_v17, 200  ;;  %v682_v3 = vmax.f32 %v1765_v51, 0.0  ;;  %v621_v6 = vsel %vm619_vm8, %v620_v44, %v618_v1  ;;  %vm638_vm0 = vcmp.eq.f32.partialorder %v1746_v14, inf  ;;  %v1034_v57 = vpop.eup %1033 }
 0x15a   : > { %v641_v11 = vand.u32 2147483648, %v1746_v14  ;;  %v670_v25 = vadd.f32 1.0, %v657_v0  ;;  %v449_v26 = vsel %vm448_vm9, %v1674_v41, %v447_v2  ;;  %v623_v13 = vmul.f32 %v1032_v28, %v1691_v4 }
 0x15b   : > { %1045 = vrsqrt.f32 %v1787_v63  ;;  %v452_v54 = vsel %vm450_vm10, %v451_v47, %v449_v26  ;;  %v454_v27 = vmul.f32 %v1034_v57, %v1693_v5  ;;  %vm469_vm8 = vcmp.eq.f32.partialorder %v1748_v8, inf  ;;  %v1036_v30 = vpop.eup %1035 }
 0x15c   : > { %v472_v12 = vand.u32 2147483648, %v1748_v8  ;;  %v625_v33 = vsel %vm624_vm11, %v1691_v4, %v623_v13  ;;  %v648_v34 = vand.u32 2147483648, %v1772_v59  ;;  %v479_v36 = vand.u32 2147483648, %v1787_v63  ;;  %v1038_v41 = vpop.eup %1037 }
 0x15d   : > { %v456_v37 = vsel %vm455_vm13, %v1693_v5, %v454_v27  ;;  %v630_v40 = vmul.f32 %v1036_v30, %v1718_v58  ;;  %vm647_vm10 = vcmp.eq.f32.partialorder %v1772_v59, 0.0  ;;  %v628_v43 = vsel %vm626_vm12, %v627_v49, %v625_v33 }
 0x15e   : > { %v658_v7 = vsub.f32 %v452_v54, %v621_v6  ;;  %vm727_vm11 = vcmp.lt.s32.totalorder %v1536_v19, 200  ;;  %v461_v44 = vmul.f32 %v1038_v41, %v1720_v32  ;;  %vm476_vm9 = vcmp.eq.f32.partialorder %v1787_v63, inf }
 0x15f   : > { %v459_v29 = vsel %vm457_vm15, %v458_v55, %v456_v37  ;;  %vm640_vm7 = vcmp.eq.f32.partialorder %v1746_v14, 0.0  ;;  %v683_v45 = vmax.f32 %v670_v25, 0.0  ;;  %v1040_v46 = vpop.eup %1039  ;;  %v632_v47 = vsel %vm631_vm2, %v1718_v58, %v630_v40 }
 0x160   : > { %v659_v4 = vsub.f32 %v459_v29, %v628_v43  ;;  %v671_v9 = vadd.f32 1.0, %v658_v7  ;;  %vm728_vm12 = vcmp.lt.s32.totalorder %v1539_v20, 200  ;;  %v736_v48 = vsel %vm723_vm14, %v681_v23, 0.0 }
 0x161   : > { %v463_v5 = vsel %vm462_vm4, %v1720_v32, %v461_v44  ;;  %v637_v49 = vmul.f32 %v1040_v46, %v1746_v14  ;;  %v635_v50 = vsel %vm633_vm3, %v634_v38, %v632_v47  ;;  %v737_v51 = vsel %vm724_vm1, %v682_v3, 0.0  ;;  %v1042_v52 = vpop.eup %1041 }
 0x162   : > { %v466_v55 = vsel %vm464_vm5, %v465_v62, %v463_v5  ;;  %v672_v35 = vadd.f32 1.0, %v659_v4  ;;  %v684_v60 = vmax.f32 %v671_v9, 0.0  ;;  %v751_v15 = vadd.f32 %v1713_v31, %v1702_v24  ;;  %v1044_v23 = vpop.eup %1043 }
 0x163   : > { %v468_v10 = vmul.f32 %v1042_v52, %v1748_v8  ;;  %v639_v58 = vsel %vm638_vm0, %v1746_v14, %v637_v49  ;;  %v660_v38 = vsub.f32 %v466_v55, %v635_v50  ;;  %vm1956_vm13 = vcmask 7168  }
 0x164   : > { %v752_v16 = vsel %vm1956_vm13, %v1734_v39, 0.0  ;;  %v644_v42 = vmul.f32 %v1044_v23, %v1772_v59  ;;  %v642_v32 = vsel %vm640_vm7, %v641_v11, %v639_v58  ;;  %v685_v61 = vmax.f32 %v672_v35, 0.0  ;;  %vm1957_vm0 = vmmov %vm1956_vm13 }
 0x165   : > { %v738_v24 = vsel %vm725_vm6, %v683_v45, 0.0  ;;  %v1046_v31 = vpop.eup %1045  ;;  %v470_v62 = vsel %vm469_vm8, %v1748_v8, %v468_v10  ;;  %v673_v0 = vadd.f32 1.0, %v660_v38  ;;  %v753_v1 = vadd.f32 %v752_v16, %v751_v15  ;;  %vm1961_vm3 = vmmov %vm1957_vm0 }
 0x166   : > { %v754_v2 = vsel %vm1957_vm0, %v736_v48, 0.0  ;;  %vm1958_vm14 = vcmp.eq.f32.partialorder %v1772_v59, inf  ;;  %v475_v14 = vmul.f32 %v1046_v31, %v1787_v63  ;;  %vm1959_vm15 = vcmp.eq.f32.partialorder %v1748_v8, 0.0  ;;  %vm1962_vm4 = vmmov %vm1957_vm0 }
 0x167   : > { %v646_v39 = vsel %vm1958_vm14, %v1772_v59, %v644_v42  ;;  %v473_v28 = vsel %vm1959_vm15, %v472_v12, %v470_v62  ;;  %vm1960_vm1 = vcmp.lt.s32.totalorder %v1534_v18, 200  ;;  %v686_v11 = vmax.f32 %v673_v0, 0.0  ;;  %vm1963_vm6 = vmmov %vm1957_vm0 }
 0x168   : > { %v739_v17 = vsel %vm1960_vm1, %v684_v60, 0.0  ;;  %v649_v3 = vsel %vm647_vm10, %v648_v34, %v646_v39  ;;  %v661_v6 = vsub.f32 %v473_v28, %v642_v32  ;;  %v755_v57 = vadd.f32 %v754_v2, %v753_v1  ;;  %vm1964_vm7 = vmmov %vm1957_vm0 }
 0x169   : > { %v477_v25 = vsel %vm476_vm9, %v1787_v63, %v475_v14  ;;  %vm478_vm2 = vcmp.eq.f32.partialorder %v1787_v63, 0.0  ;;  %v756_v26 = vsel %vm1961_vm3, %v737_v51, 0.0  ;;  %v758_v8 = vsel %vm1962_vm4, %v738_v24, 0.0  ;;  %vm1965_vm9 = vmmov %vm1957_vm0 }
 0x16a   : > { %v480_v13 = vsel %vm478_vm2, %v479_v36, %v477_v25  ;;  %v674_v54 = vadd.f32 1.0, %v661_v6  ;;  %v740_v18 = vsel %vm727_vm11, %v685_v61, 0.0  ;;  %v757_v59 = vadd.f32 %v756_v26, %v755_v57  ;;  %vm1966_vm10 = vmmov %vm1957_vm0 }
 0x16b   : > { %v662_v27 = vsub.f32 %v480_v13, %v649_v3  ;;  %vm729_vm5 = vcmp.lt.s32.totalorder %v1541_v21, 200  ;;  %v760_v12 = vsel %vm1963_vm6, %v739_v17, 0.0  ;;  %v741_v33 = vsel %vm728_vm12, %v686_v11, 0.0  ;;  %vm1967_vm11 = vmmov %vm1957_vm0 }
 0x16c   : > { %v687_v30 = vmax.f32 %v674_v54, 0.0  ;;  %v759_v63 = vadd.f32 %v758_v8, %v757_v59  ;;  %v762_v41 = vsel %vm1964_vm7, %v740_v18, 0.0  ;;  %vm730_vm8 = vcmp.lt.s32.totalorder %v1543_v22, 200 }
 0x16d   : > { %v675_v34 = vadd.f32 1.0, %v662_v27  ;;  %v764_v40 = vsel %vm1965_vm9, %v741_v33, 0.0  ;;  %v780_v49 = vand.u32 127, %v689_v53  ;;  %vm781_vm12 = vcmp.eq.s32.totalorder %v1491_v56, 0 }
 0x16e   : > { %v742_v36 = vsel %vm729_vm5, %v687_v30, 0.0  ;;  %v761_v37 = vadd.f32 %v760_v12, %v759_v63 }
 0x16f   : > { %v688_v19 = vmax.f32 %v675_v34, 0.0  ;;  %v766_v7 = vsel %vm1966_vm10, %v742_v36, 0.0  ;;  %vm782_vm13 = vcmp.eq.s32.totalorder %v780_v49, 0 }
 0x170   : > { %v763_v43 = vadd.f32 %v762_v41, %v761_v37  ;;  %vm783_vm0 = vmand %vm781_vm12, %vm782_vm13 }
 0x171   : > { %v743_v21 = vsel %vm730_vm8, %v688_v19, 0.0 }
 0x172   : > { %v765_v44 = vadd.f32 %v764_v40, %v763_v43  ;;  %v768_v20 = vsel %vm1967_vm11, %v743_v21, 0.0 }
 0x174   : > { %v767_v29 = vadd.f32 %v766_v7, %v765_v44 }
 0x176   : > { %v769_v45 = vadd.f32 %v768_v20, %v767_v29 }
 0x178   : > { %770 = vadd.xlane.f32.xlu0 %v769_v45 }
 0x205   : > { %v771_v46 = vpop.xlane.xlu0 %770 }
 0x206   : > { %v772_v47 = vrot.slane %v771_v46, 4 }
 0x208   : > { %v773_v22 = vadd.f32 %v772_v47, %v771_v46 }
 0x20a   : > { %v774_v4 = vrot.slane %v773_v22, 2 }
 0x20c   : > { %v775_v9 = vadd.f32 %v774_v4, %v773_v22 }
 0x20e   : > { %v776_v48 = vrot.slane %v775_v9, 1 }
 0x210   : > { %v777_v5 = vadd.f32 %v776_v48, %v775_v9 }
 0x212   : > { %945 = vpush %v777_v5 }
 0x243   : > { %s946_s20 = spop %945 }
 0x244   : > { %v784_v50 = vstv %s946_s20 }
 0x245   : > { %v785_v53 = vsel %vm783_vm0, %v784_v50, 0.0 }
 0x246   : > { %786 = vst [vmem:[%s283_s17] sm:$0xff] %v785_v53 }
 0x247   : > { %1144 = shalt.err (!%p1141_p10)
}
 0x248   : > { %s1145_s7 = scalar_lea.hbm %s1901_s22, 128  ;;  %s1149_s4 = scalar_lea.hbm %s1948_s3, 256 }
 0x249   : > { %p1146_p1 = scmp.ne.s32.totalorder %s1901_s22, %s1145_s7  ;;  %p1150_p3 = scmp.lt.u32.totalorder %s1901_s22, %s1948_s3 }
 0x24a   : > { %p1151_p9 = scmp.lt.u32.totalorder %s1149_s4, %s1145_s7  ;;  %p1153_p6 = scmp.lt.u32.totalorder %s1145_s7, %s1901_s22 }
 0x24b   : > { %p1147_p4 = pnand %p1146_p1, %p1968_p5 }
 0x24c   : > { %p1152_p11 = por %p1151_p9, %p1150_p3 }
 0x24d   : > { %p1148_p7 = pneg %p1147_p4 }
 0x24e   : > { %p1154_p13 = por %p1153_p6, %p1152_p11 }
 0x250   : > { %p1155_p8 = pnand %p1154_p13, %p1148_p7 }
 0x252   : > { %1158 = shalt.err (!%p1155_p8)
}
 0x253   : > { %950 = dma.vmem_to_hbm [thread:$0]  (%p1968_p5), %s1903_s19, 128, %s1901_s22, %s788_s8  }
 0x254 PF: > { %s813_s9 = sand.u32 1, %s1189_s12   ;;  %p1969_p12 = scmp.ne.s32.totalorder %s1955_s25, 0 }
 0x255   : > { %p1970_p0 = scmp.ge.s32.totalorder %s1201_s15, 2  ;;  %s814_s10 = scalar_lea.sflag [#allocation4], %s813_s9 }
 0x257   : > { %p953_p2 = pnand %p1970_p0, %p1969_p12 }
 0x259   : > { %1184 = dma.done.wait (!%p953_p2), %s814_s10, 128  }
 0x25a   : > { %1186 = vsyncadd (!%p953_p2), %s814_s10, 4294967168  ;;  %p19_p10 = scmp.ge.s32.totalorder %s1258_s18, 4   ;;  %s1971_s12 = smov %s1193_s13 }
 0x25b   : > { %s1972_s13 = smov %s1197_s14  ;;  %s1973_s14 = smov %s1270_s21 }
 0x25c   : > { %s1974_s15 = smov %s1258_s18  ;;  %21 = sbr.rel (!%p19_p10) target bundleno = 7 (0x7), region = 101 }
 0x263   :  { %819 = vsyncpa [#allocation3], 1 }
 0x264   :  { %821 = vsyncpa [#allocation3 + $0x1], 1 }
 0x265   :  { %822 = vsyncpa [#allocation6], 1 }
 0x266   :  { %824 = vsyncpa [#allocation6 + $0x1], 1 }
 0x267   :  { %825 = vsyncpa [#allocation4], 1 }
 0x268   :  { %827 = vsyncpa [#allocation4 + $0x1], 1 }

</bundles_post_ra>
